<compile_context>
chip_gen: v5e
topology: v5e:2x2
jax: 0.10.0
libtpu: 0.0.40
codegen_flags: <defaults>
</compile_context>

<pallas_src>
import math

import jax
import jax.numpy as jnp
from jax import lax
from jax.experimental import pallas as pl
from jax.experimental.pallas import tpu as pltpu


def _cross_attn_kernel(tgt_ref, qpos_ref, mem_ref, kpos_ref,
                       wq_ref, bq_ref, wk_ref, bk_ref, wv_ref, bv_ref,
                       wo_ref, bo_ref, gamma_ref, beta_ref,
                       o_ref, acc_ref):
    # tgt_ref/qpos_ref: (1, L, D)   mem_ref/kpos_ref: (1, S, D)
    # wq/wk/wv_ref:     (1, D, Dh)  bq/bk/bv_ref:     (1, 1, Dh)
    # wo_ref:           (1, Dh, D)  bo/gamma/beta:    (1, D)
    # o_ref: (1, L, D)  acc_ref: (L, D) f32 scratch (out-proj accumulator)
    h = pl.program_id(1)

    @pl.when(h == 0)
    def _init():
        acc_ref[...] = jnp.zeros_like(acc_ref)

    # Pos-embed added to q/k sources only; value path uses raw memory.
    q_src = tgt_ref[0] + qpos_ref[0]          # (L, D)
    k_src = mem_ref[0] + kpos_ref[0]          # (S, D)
    v_src = mem_ref[0]                        # (S, D)

    # Per-head projections (MXU, f32 accumulation; no operand up-casts).
    q = jnp.dot(q_src, wq_ref[0], preferred_element_type=jnp.float32) + bq_ref[0]
    k = jnp.dot(k_src, wk_ref[0], preferred_element_type=jnp.float32) + bk_ref[0]
    v = jnp.dot(v_src, wv_ref[0], preferred_element_type=jnp.float32) + bv_ref[0]

    dh = q.shape[-1]
    scale = 1.0 / math.sqrt(dh)

    # Scaled dot-product attention; contract head dims directly (no explicit k.T).
    s = lax.dot_general(q, k, (((1,), (1,)), ((), ())),
                        preferred_element_type=jnp.float32) * scale      # (L, S)
    s = s - jnp.max(s, axis=-1, keepdims=True)
    p = jnp.exp(s)
    p = p / jnp.sum(p, axis=-1, keepdims=True)
    ctx = jnp.dot(p, v, preferred_element_type=jnp.float32)              # (L, Dh)

    # This head's slice of the output projection, accumulated over the head axis.
    acc_ref[...] += jnp.dot(ctx, wo_ref[0], preferred_element_type=jnp.float32)

    @pl.when(h == pl.num_programs(1) - 1)
    def _finalize():
        attn_out = acc_ref[...] + bo_ref[...]                  # (L, D)
        y = tgt_ref[0].astype(jnp.float32) + attn_out          # residual (dropout p=0)
        mean = jnp.mean(y, axis=-1, keepdims=True)
        c = y - mean
        var = jnp.mean(c * c, axis=-1, keepdims=True)
        y_hat = c * lax.rsqrt(var + 1e-5)
        o_ref[0] = (y_hat * gamma_ref[...] + beta_ref[...]).astype(o_ref.dtype)


def cross_attention_layer(tgt, memory, wq, bq, wk, bk, wv, bv, wo, bo,
                          gamma, beta, *, nhead, tgt_pos=None, memory_pos=None):
    """tgt: (L, B, D), memory: (S, B, D); weights stored (in, out) = PyTorch weight.T.
    Returns (L, B, D)."""
    L, B, D = tgt.shape
    S = memory.shape[0]
    H = nhead
    assert D % H == 0, "d_model must be divisible by nhead"
    Dh = D // H

    if tgt_pos is None:
        tgt_pos = jnp.zeros_like(tgt)
    if memory_pos is None:
        memory_pos = jnp.zeros_like(memory)

    # Batch-major layout for per-batch blocking; keeps D whole on the lane axis.
    tgt_b = jnp.transpose(tgt, (1, 0, 2))
    qpos_b = jnp.transpose(tgt_pos, (1, 0, 2))
    mem_b = jnp.transpose(memory, (1, 0, 2))
    kpos_b = jnp.transpose(memory_pos, (1, 0, 2))

    # Split projection weights per head so every block dim is a full array dim.
    wq_h = wq.reshape(D, H, Dh).transpose(1, 0, 2)   # (H, D, Dh)
    wk_h = wk.reshape(D, H, Dh).transpose(1, 0, 2)
    wv_h = wv.reshape(D, H, Dh).transpose(1, 0, 2)
    wo_h = wo.reshape(H, Dh, D)                      # (H, Dh, D)
    bq_h = bq.reshape(H, 1, Dh)
    bk_h = bk.reshape(H, 1, Dh)
    bv_h = bv.reshape(H, 1, Dh)
    bo_2d = bo.reshape(1, D)
    gamma_2d = gamma.reshape(1, D)
    beta_2d = beta.reshape(1, D)

    act_spec_L = pl.BlockSpec((1, L, D), lambda b, h: (b, 0, 0))
    act_spec_S = pl.BlockSpec((1, S, D), lambda b, h: (b, 0, 0))
    w_in_spec = pl.BlockSpec((1, D, Dh), lambda b, h: (h, 0, 0))
    b_in_spec = pl.BlockSpec((1, 1, Dh), lambda b, h: (h, 0, 0))
    w_out_spec = pl.BlockSpec((1, Dh, D), lambda b, h: (h, 0, 0))
    vec_spec = pl.BlockSpec((1, D), lambda b, h: (0, 0))

    # Advisory cost hint: projections + attention matmuls (f32 demo dtype).
    flops = 2 * B * (L * D * D + 2 * S * D * D + 2 * L * S * D + L * D * D)
    bytes_accessed = 4 * (2 * L * B * D + 2 * S * B * D + L * B * D
                          + 4 * D * D + 6 * D)

    out = pl.pallas_call(
        _cross_attn_kernel,
        out_shape=jax.ShapeDtypeStruct((B, L, D), tgt.dtype),
        grid_spec=pltpu.PrefetchScalarGridSpec(
            num_scalar_prefetch=0,
            grid=(B, H),
            in_specs=[
                act_spec_L,              # tgt
                act_spec_L,              # tgt_pos
                act_spec_S,              # memory
                act_spec_S,              # memory_pos
                w_in_spec, b_in_spec,    # Wq, bq
                w_in_spec, b_in_spec,    # Wk, bk
                w_in_spec, b_in_spec,    # Wv, bv
                w_out_spec, vec_spec,    # Wo, bo
                vec_spec, vec_spec,      # gamma, beta
            ],
            out_specs=pl.BlockSpec((1, L, D), lambda b, h: (b, 0, 0)),
            scratch_shapes=[pltpu.VMEM((L, D), jnp.float32)],
        ),
        compiler_params=pltpu.CompilerParams(
            dimension_semantics=("parallel", "arbitrary")),
        cost_estimate=pl.CostEstimate(
            flops=flops,
            transcendentals=B * H * L * S,
            bytes_accessed=bytes_accessed),
    )(tgt_b, qpos_b, mem_b, kpos_b,
      wq_h, bq_h, wk_h, bk_h, wv_h, bv_h,
      wo_h, bo_2d, gamma_2d, beta_2d)

    return jnp.transpose(out, (1, 0, 2))  # back to (L, B, D)


def _xavier_uniform(key, shape, dtype=jnp.float32):
    fan_in, fan_out = shape
    limit = (6.0 / (fan_in + fan_out)) ** 0.5
    return jax.random.uniform(key, shape, dtype, minval=-limit, maxval=limit)


if __name__ == "__main__":
    # Small shapes: queries=8, memory tokens=16, batch=2, d_model=32, heads=4.
    L, S, B, D, H = 8, 16, 2, 32, 4
    Dh = D // H

    key = jax.random.PRNGKey(0)
    ks = jax.random.split(key, 8)

    tgt = jax.random.normal(ks[0], (L, B, D), jnp.float32)
    memory = jax.random.normal(ks[1], (S, B, D), jnp.float32)
    tgt_pos = 0.1 * jax.random.normal(ks[2], (L, B, D), jnp.float32)
    memory_pos = 0.1 * jax.random.normal(ks[3], (S, B, D), jnp.float32)

    # Parameters (stored transposed vs. PyTorch nn.Linear.weight: (in, out)).
    wq = _xavier_uniform(ks[4], (D, D))
    wk = _xavier_uniform(ks[5], (D, D))
    wv = _xavier_uniform(ks[6], (D, D))
    wo = _xavier_uniform(ks[7], (D, D))
    bq = jnp.zeros((D,), jnp.float32)
    bk = jnp.zeros((D,), jnp.float32)
    bv = jnp.zeros((D,), jnp.float32)
    bo = jnp.zeros((D,), jnp.float32)
    gamma = jnp.ones((D,), jnp.float32)
    beta = jnp.zeros((D,), jnp.float32)

    out = cross_attention_layer(tgt, memory, wq, bq, wk, bk, wv, bv, wo, bo,
                                gamma, beta, nhead=H,
                                tgt_pos=tgt_pos, memory_pos=memory_pos)
    out = jax.block_until_ready(out)

    # Pure-JAX reference (same math as the PyTorch module with dropout=0).
    q_src = tgt + tgt_pos
    k_src = memory + memory_pos
    q = q_src @ wq + bq            # (L, B, D)
    k = k_src @ wk + bk            # (S, B, D)
    v = memory @ wv + bv           # (S, B, D)
    qh = q.reshape(L, B, H, Dh).transpose(1, 2, 0, 3)   # (B, H, L, Dh)
    kh = k.reshape(S, B, H, Dh).transpose(1, 2, 0, 3)   # (B, H, S, Dh)
    vh = v.reshape(S, B, H, Dh).transpose(1, 2, 0, 3)   # (B, H, S, Dh)
    scores = jnp.einsum('bhld,bhsd->bhls', qh, kh) / jnp.sqrt(float(Dh))
    probs = jax.nn.softmax(scores, axis=-1)
    ctx = jnp.einsum('bhls,bhsd->bhld', probs, vh)      # (B, H, L, Dh)
    ctx = ctx.transpose(2, 0, 1, 3).reshape(L, B, D)
    attn_out = ctx @ wo + bo
    y = tgt + attn_out
    mu = y.mean(-1, keepdims=True)
    var = ((y - mu) ** 2).mean(-1, keepdims=True)
    ref = (y - mu) / jnp.sqrt(var + 1e-5) * gamma + beta

    assert jnp.allclose(out, ref, atol=1e-4, rtol=1e-4), "mismatch vs reference"
    print("KERNEL_OK")
</pallas_src>

<mosaic_0001>
module attributes {stable_mosaic.version = 11 : i64} {
  func.func @_cross_attn_kernel(%arg0: i32, %arg1: i32, %arg2: memref<1x8x32xf32, #tpu.memory_space<vmem>>, %arg3: memref<1x8x32xf32, #tpu.memory_space<vmem>>, %arg4: memref<1x16x32xf32, #tpu.memory_space<vmem>>, %arg5: memref<1x16x32xf32, #tpu.memory_space<vmem>>, %arg6: memref<1x32x8xf32, #tpu.memory_space<vmem>>, %arg7: memref<1x1x8xf32, #tpu.memory_space<vmem>>, %arg8: memref<1x32x8xf32, #tpu.memory_space<vmem>>, %arg9: memref<1x1x8xf32, #tpu.memory_space<vmem>>, %arg10: memref<1x32x8xf32, #tpu.memory_space<vmem>>, %arg11: memref<1x1x8xf32, #tpu.memory_space<vmem>>, %arg12: memref<1x8x32xf32, #tpu.memory_space<vmem>>, %arg13: memref<1x32xf32, #tpu.memory_space<vmem>>, %arg14: memref<1x32xf32, #tpu.memory_space<vmem>>, %arg15: memref<1x32xf32, #tpu.memory_space<vmem>>, %arg16: memref<1x8x32xf32, #tpu.memory_space<vmem>>, %arg17: memref<8x32xf32, #tpu.memory_space<vmem>>) attributes {dimension_semantics = [#tpu.dimension_semantics<parallel>, #tpu.dimension_semantics<arbitrary>], iteration_bounds = array<i64: 2, 4>, scalar_prefetch = 0 : i64, scratch_operands = 1 : i64, tpu.core_type = #tpu.core_type<tc>, window_params = [{transform_indices = @transform_0, window_bounds = array<i64: 1, 8, 32>}, {transform_indices = @transform_1, window_bounds = array<i64: 1, 8, 32>}, {transform_indices = @transform_2, window_bounds = array<i64: 1, 16, 32>}, {transform_indices = @transform_3, window_bounds = array<i64: 1, 16, 32>}, {transform_indices = @transform_4, window_bounds = array<i64: 1, 32, 8>}, {transform_indices = @transform_5, window_bounds = array<i64: 1, 1, 8>}, {transform_indices = @transform_6, window_bounds = array<i64: 1, 32, 8>}, {transform_indices = @transform_7, window_bounds = array<i64: 1, 1, 8>}, {transform_indices = @transform_8, window_bounds = array<i64: 1, 32, 8>}, {transform_indices = @transform_9, window_bounds = array<i64: 1, 1, 8>}, {transform_indices = @transform_10, window_bounds = array<i64: 1, 8, 32>}, {pipeline_mode = #tpu.pipeline_mode<synchronous>, transform_indices = @transform_11, window_bounds = array<i64: 1, 32>}, {pipeline_mode = #tpu.pipeline_mode<synchronous>, transform_indices = @transform_12, window_bounds = array<i64: 1, 32>}, {pipeline_mode = #tpu.pipeline_mode<synchronous>, transform_indices = @transform_13, window_bounds = array<i64: 1, 32>}, {transform_indices = @transform_14, window_bounds = array<i64: 1, 8, 32>}]} {
    %c0_i32 = arith.constant 0 : i32
    %0 = arith.cmpi eq, %arg1, %c0_i32 : i32
    %1 = arith.extui %0 : i1 to i32
    %c0_i32_0 = arith.constant 0 : i32
    %2 = arith.cmpi ne, %1, %c0_i32_0 : i32
    scf.if %2 {
      %cst_49 = arith.constant 0.000000e+00 : f32
      %58 = vector.broadcast %cst_49 : f32 to vector<8x32xf32>
      %c0_50 = arith.constant 0 : index
      %c0_51 = arith.constant 0 : index
      %59 = vector.load %arg17[%c0_50, %c0_51] : memref<8x32xf32, #tpu.memory_space<vmem>>, vector<8x32xf32>
      tpu.vector_store %arg17[%c0_50, %c0_51], %58 {strides = array<i32>} : memref<8x32xf32, #tpu.memory_space<vmem>>, vector<8x32xf32>,
    } else {
    }
    %c0 = arith.constant 0 : index
    %c0_1 = arith.constant 0 : index
    %c0_2 = arith.constant 0 : index
    %3 = vector.load %arg2[%c0, %c0_1, %c0_2] : memref<1x8x32xf32, #tpu.memory_space<vmem>>, vector<1x8x32xf32>
    %4 = vector.shape_cast %3 : vector<1x8x32xf32> to vector<8x32xf32>
    %c0_3 = arith.constant 0 : index
    %c0_4 = arith.constant 0 : index
    %c0_5 = arith.constant 0 : index
    %5 = vector.load %arg3[%c0_3, %c0_4, %c0_5] : memref<1x8x32xf32, #tpu.memory_space<vmem>>, vector<1x8x32xf32>
    %6 = vector.shape_cast %5 : vector<1x8x32xf32> to vector<8x32xf32>
    %7 = arith.addf %4, %6 : vector<8x32xf32>
    %c0_6 = arith.constant 0 : index
    %c0_7 = arith.constant 0 : index
    %c0_8 = arith.constant 0 : index
    %8 = vector.load %arg4[%c0_6, %c0_7, %c0_8] : memref<1x16x32xf32, #tpu.memory_space<vmem>>, vector<1x16x32xf32>
    %9 = vector.shape_cast %8 : vector<1x16x32xf32> to vector<16x32xf32>
    %c0_9 = arith.constant 0 : index
    %c0_10 = arith.constant 0 : index
    %c0_11 = arith.constant 0 : index
    %10 = vector.load %arg5[%c0_9, %c0_10, %c0_11] : memref<1x16x32xf32, #tpu.memory_space<vmem>>, vector<1x16x32xf32>
    %11 = vector.shape_cast %10 : vector<1x16x32xf32> to vector<16x32xf32>
    %12 = arith.addf %9, %11 : vector<16x32xf32>
    %c0_12 = arith.constant 0 : index
    %c0_13 = arith.constant 0 : index
    %c0_14 = arith.constant 0 : index
    %13 = vector.load %arg4[%c0_12, %c0_13, %c0_14] : memref<1x16x32xf32, #tpu.memory_space<vmem>>, vector<1x16x32xf32>
    %14 = vector.shape_cast %13 : vector<1x16x32xf32> to vector<16x32xf32>
    %c0_15 = arith.constant 0 : index
    %c0_16 = arith.constant 0 : index
    %c0_17 = arith.constant 0 : index
    %15 = vector.load %arg6[%c0_15, %c0_16, %c0_17] : memref<1x32x8xf32, #tpu.memory_space<vmem>>, vector<1x32x8xf32>
    %16 = vector.shape_cast %15 : vector<1x32x8xf32> to vector<32x8xf32>
    %cst = arith.constant dense<0.000000e+00> : vector<8x8xf32>
    %17 = tpu.matmul %7, %16, %cst {dimension_numbers = #tpu.dot_dimension_numbers<[1], [0], [0], [1], [0, 0, 1, 1], [], []>} : vector<8x32xf32>, vector<32x8xf32>, vector<8x8xf32> -> vector<8x8xf32>
    %c0_18 = arith.constant 0 : index
    %c0_19 = arith.constant 0 : index
    %c0_20 = arith.constant 0 : index
    %18 = vector.load %arg7[%c0_18, %c0_19, %c0_20] : memref<1x1x8xf32, #tpu.memory_space<vmem>>, vector<1x1x8xf32>
    %19 = vector.shape_cast %18 : vector<1x1x8xf32> to vector<1x8xf32>
    %20 = vector.broadcast %19 : vector<1x8xf32> to vector<8x8xf32>
    %21 = arith.addf %17, %20 : vector<8x8xf32>
    %c0_21 = arith.constant 0 : index
    %c0_22 = arith.constant 0 : index
    %c0_23 = arith.constant 0 : index
    %22 = vector.load %arg8[%c0_21, %c0_22, %c0_23] : memref<1x32x8xf32, #tpu.memory_space<vmem>>, vector<1x32x8xf32>
    %23 = vector.shape_cast %22 : vector<1x32x8xf32> to vector<32x8xf32>
    %cst_24 = arith.constant dense<0.000000e+00> : vector<16x8xf32>
    %24 = tpu.matmul %12, %23, %cst_24 {dimension_numbers = #tpu.dot_dimension_numbers<[1], [0], [0], [1], [0, 0, 1, 1], [], []>} : vector<16x32xf32>, vector<32x8xf32>, vector<16x8xf32> -> vector<16x8xf32>
    %c0_25 = arith.constant 0 : index
    %c0_26 = arith.constant 0 : index
    %c0_27 = arith.constant 0 : index
    %25 = vector.load %arg9[%c0_25, %c0_26, %c0_27] : memref<1x1x8xf32, #tpu.memory_space<vmem>>, vector<1x1x8xf32>
    %26 = vector.shape_cast %25 : vector<1x1x8xf32> to vector<1x8xf32>
    %27 = vector.broadcast %26 : vector<1x8xf32> to vector<16x8xf32>
    %28 = arith.addf %24, %27 : vector<16x8xf32>
    %c0_28 = arith.constant 0 : index
    %c0_29 = arith.constant 0 : index
    %c0_30 = arith.constant 0 : index
    %29 = vector.load %arg10[%c0_28, %c0_29, %c0_30] : memref<1x32x8xf32, #tpu.memory_space<vmem>>, vector<1x32x8xf32>
    %30 = vector.shape_cast %29 : vector<1x32x8xf32> to vector<32x8xf32>
    %cst_31 = arith.constant dense<0.000000e+00> : vector<16x8xf32>
    %31 = tpu.matmul %14, %30, %cst_31 {dimension_numbers = #tpu.dot_dimension_numbers<[1], [0], [0], [1], [0, 0, 1, 1], [], []>} : vector<16x32xf32>, vector<32x8xf32>, vector<16x8xf32> -> vector<16x8xf32>
    %c0_32 = arith.constant 0 : index
    %c0_33 = arith.constant 0 : index
    %c0_34 = arith.constant 0 : index
    %32 = vector.load %arg11[%c0_32, %c0_33, %c0_34] : memref<1x1x8xf32, #tpu.memory_space<vmem>>, vector<1x1x8xf32>
    %33 = vector.shape_cast %32 : vector<1x1x8xf32> to vector<1x8xf32>
    %34 = vector.broadcast %33 : vector<1x8xf32> to vector<16x8xf32>
    %35 = arith.addf %31, %34 : vector<16x8xf32>
    %cst_35 = arith.constant dense<0.000000e+00> : vector<8x16xf32>
    %36 = tpu.matmul %21, %28, %cst_35 {dimension_numbers = #tpu.dot_dimension_numbers<[1], [1], [0], [0], [0, 0, 1, 0], [], []>} : vector<8x8xf32>, vector<16x8xf32>, vector<8x16xf32> -> vector<8x16xf32>
    %cst_36 = arith.constant 0.353553385 : f32
    %37 = vector.broadcast %cst_36 : f32 to vector<8x16xf32>
    %38 = arith.mulf %36, %37 : vector<8x16xf32>
    %cst_37 = arith.constant dense<0xFF800000> : vector<8xf32>
    %39 = vector.multi_reduction <maximumf>, %38, %cst_37 [1] : vector<8x16xf32> to vector<8xf32>
    %40 = vector.shape_cast %39 : vector<8xf32> to vector<8x1xf32>
    %41 = vector.broadcast %40 : vector<8x1xf32> to vector<8x16xf32>
    %42 = arith.subf %38, %41 : vector<8x16xf32>
    %43 = math.exp %42 : vector<8x16xf32>
    %cst_38 = arith.constant dense<0.000000e+00> : vector<8xf32>
    %44 = vector.multi_reduction <add>, %43, %cst_38 [1] : vector<8x16xf32> to vector<8xf32>
    %45 = vector.shape_cast %44 : vector<8xf32> to vector<8x1xf32>
    %46 = vector.broadcast %45 : vector<8x1xf32> to vector<8x16xf32>
    %47 = arith.divf %43, %46 : vector<8x16xf32>
    %cst_39 = arith.constant dense<0.000000e+00> : vector<8x8xf32>
    %48 = tpu.matmul %47, %35, %cst_39 {dimension_numbers = #tpu.dot_dimension_numbers<[1], [0], [0], [1], [0, 0, 1, 1], [], []>} : vector<8x16xf32>, vector<16x8xf32>, vector<8x8xf32> -> vector<8x8xf32>
    %c0_40 = arith.constant 0 : index
    %c0_41 = arith.constant 0 : index
    %49 = vector.load %arg17[%c0_40, %c0_41] : memref<8x32xf32, #tpu.memory_space<vmem>>, vector<8x32xf32>
    %c0_42 = arith.constant 0 : index
    %c0_43 = arith.constant 0 : index
    %c0_44 = arith.constant 0 : index
    %50 = vector.load %arg12[%c0_42, %c0_43, %c0_44] : memref<1x8x32xf32, #tpu.memory_space<vmem>>, vector<1x8x32xf32>
    %51 = vector.shape_cast %50 : vector<1x8x32xf32> to vector<8x32xf32>
    %cst_45 = arith.constant dense<0.000000e+00> : vector<8x32xf32>
    %52 = tpu.matmul %48, %51, %cst_45 {dimension_numbers = #tpu.dot_dimension_numbers<[1], [0], [0], [1], [0, 0, 1, 1], [], []>} : vector<8x8xf32>, vector<8x32xf32>, vector<8x32xf32> -> vector<8x32xf32>
    %53 = arith.addf %49, %52 : vector<8x32xf32>
    %c0_46 = arith.constant 0 : index
    %c0_47 = arith.constant 0 : index
    %54 = vector.load %arg17[%c0_46, %c0_47] : memref<8x32xf32, #tpu.memory_space<vmem>>, vector<8x32xf32>
    tpu.vector_store %arg17[%c0_46, %c0_47], %53 {strides = array<i32>} : memref<8x32xf32, #tpu.memory_space<vmem>>, vector<8x32xf32>,
    %c3_i32 = arith.constant 3 : i32
    %55 = arith.cmpi eq, %arg1, %c3_i32 : i32
    %56 = arith.extui %55 : i1 to i32
    %c0_i32_48 = arith.constant 0 : i32
    %57 = arith.cmpi ne, %56, %c0_i32_48 : i32
    scf.if %57 {
      %c0_49 = arith.constant 0 : index
      %c0_50 = arith.constant 0 : index
      %58 = vector.load %arg17[%c0_49, %c0_50] : memref<8x32xf32, #tpu.memory_space<vmem>>, vector<8x32xf32>
      %c0_51 = arith.constant 0 : index
      %c0_52 = arith.constant 0 : index
      %59 = vector.load %arg13[%c0_51, %c0_52] : memref<1x32xf32, #tpu.memory_space<vmem>>, vector<1x32xf32>
      %60 = vector.broadcast %59 : vector<1x32xf32> to vector<8x32xf32>
      %61 = arith.addf %58, %60 : vector<8x32xf32>
      %c0_53 = arith.constant 0 : index
      %c0_54 = arith.constant 0 : index
      %c0_55 = arith.constant 0 : index
      %62 = vector.load %arg2[%c0_53, %c0_54, %c0_55] : memref<1x8x32xf32, #tpu.memory_space<vmem>>, vector<1x8x32xf32>
      %63 = vector.shape_cast %62 : vector<1x8x32xf32> to vector<8x32xf32>
      %64 = arith.addf %63, %61 : vector<8x32xf32>
      %cst_56 = arith.constant dense<0.000000e+00> : vector<8xf32>
      %65 = vector.multi_reduction <add>, %64, %cst_56 [1] : vector<8x32xf32> to vector<8xf32>
      %66 = vector.shape_cast %65 : vector<8xf32> to vector<8x1xf32>
      %cst_57 = arith.constant 3.200000e+01 : f32
      %67 = vector.broadcast %cst_57 : f32 to vector<8x1xf32>
      %68 = arith.divf %66, %67 : vector<8x1xf32>
      %69 = vector.broadcast %68 : vector<8x1xf32> to vector<8x32xf32>
      %70 = arith.subf %64, %69 : vector<8x32xf32>
      %71 = arith.mulf %70, %70 : vector<8x32xf32>
      %cst_58 = arith.constant dense<0.000000e+00> : vector<8xf32>
      %72 = vector.multi_reduction <add>, %71, %cst_58 [1] : vector<8x32xf32> to vector<8xf32>
      %73 = vector.shape_cast %72 : vector<8xf32> to vector<8x1xf32>
      %cst_59 = arith.constant 3.200000e+01 : f32
      %74 = vector.broadcast %cst_59 : f32 to vector<8x1xf32>
      %75 = arith.divf %73, %74 : vector<8x1xf32>
      %cst_60 = arith.constant 9.99999974E-6 : f32
      %76 = vector.broadcast %cst_60 : f32 to vector<8x1xf32>
      %77 = arith.addf %75, %76 : vector<8x1xf32>
      %78 = math.rsqrt %77 : vector<8x1xf32>
      %79 = vector.broadcast %78 : vector<8x1xf32> to vector<8x32xf32>
      %80 = arith.mulf %70, %79 : vector<8x32xf32>
      %c0_61 = arith.constant 0 : index
      %c0_62 = arith.constant 0 : index
      %81 = vector.load %arg14[%c0_61, %c0_62] : memref<1x32xf32, #tpu.memory_space<vmem>>, vector<1x32xf32>
      %82 = vector.broadcast %81 : vector<1x32xf32> to vector<8x32xf32>
      %83 = arith.mulf %80, %82 : vector<8x32xf32>
      %c0_63 = arith.constant 0 : index
      %c0_64 = arith.constant 0 : index
      %84 = vector.load %arg15[%c0_63, %c0_64] : memref<1x32xf32, #tpu.memory_space<vmem>>, vector<1x32xf32>
      %85 = vector.broadcast %84 : vector<1x32xf32> to vector<8x32xf32>
      %86 = arith.addf %83, %85 : vector<8x32xf32>
      %c0_65 = arith.constant 0 : index
      %c0_66 = arith.constant 0 : index
      %c0_67 = arith.constant 0 : index
      %87 = vector.load %arg16[%c0_65, %c0_66, %c0_67] : memref<1x8x32xf32, #tpu.memory_space<vmem>>, vector<1x8x32xf32>
      %88 = vector.shape_cast %87 : vector<1x8x32xf32> to vector<8x32xf32>
      %89 = vector.shape_cast %86 : vector<8x32xf32> to vector<1x8x32xf32>
      tpu.vector_store %arg16[%c0_65, %c0_66, %c0_67], %89 {strides = array<i32>} : memref<1x8x32xf32, #tpu.memory_space<vmem>>, vector<1x8x32xf32>,
    } else {
    }
    return
  }
  func.func @transform_0(%arg0: i32, %arg1: i32) -> (i32, i32, i32) {
    %c0_i32 = arith.constant 0 : i32
    %c0_i32_0 = arith.constant 0 : i32
    %c0_i32_1 = arith.constant 0 : i32
    return %arg0, %c0_i32, %c0_i32_0 : i32, i32, i32
  }
  func.func @transform_1(%arg0: i32, %arg1: i32) -> (i32, i32, i32) {
    %c0_i32 = arith.constant 0 : i32
    %c0_i32_0 = arith.constant 0 : i32
    %c0_i32_1 = arith.constant 0 : i32
    return %arg0, %c0_i32, %c0_i32_0 : i32, i32, i32
  }
  func.func @transform_2(%arg0: i32, %arg1: i32) -> (i32, i32, i32) {
    %c0_i32 = arith.constant 0 : i32
    %c0_i32_0 = arith.constant 0 : i32
    %c0_i32_1 = arith.constant 0 : i32
    return %arg0, %c0_i32, %c0_i32_0 : i32, i32, i32
  }
  func.func @transform_3(%arg0: i32, %arg1: i32) -> (i32, i32, i32) {
    %c0_i32 = arith.constant 0 : i32
    %c0_i32_0 = arith.constant 0 : i32
    %c0_i32_1 = arith.constant 0 : i32
    return %arg0, %c0_i32, %c0_i32_0 : i32, i32, i32
  }
  func.func @transform_4(%arg0: i32, %arg1: i32) -> (i32, i32, i32) {
    %c0_i32 = arith.constant 0 : i32
    %c0_i32_0 = arith.constant 0 : i32
    %c0_i32_1 = arith.constant 0 : i32
    return %arg1, %c0_i32, %c0_i32_0 : i32, i32, i32
  }
  func.func @transform_5(%arg0: i32, %arg1: i32) -> (i32, i32, i32) {
    %c0_i32 = arith.constant 0 : i32
    %c0_i32_0 = arith.constant 0 : i32
    %c0_i32_1 = arith.constant 0 : i32
    return %arg1, %c0_i32, %c0_i32_0 : i32, i32, i32
  }
  func.func @transform_6(%arg0: i32, %arg1: i32) -> (i32, i32, i32) {
    %c0_i32 = arith.constant 0 : i32
    %c0_i32_0 = arith.constant 0 : i32
    %c0_i32_1 = arith.constant 0 : i32
    return %arg1, %c0_i32, %c0_i32_0 : i32, i32, i32
  }
  func.func @transform_7(%arg0: i32, %arg1: i32) -> (i32, i32, i32) {
    %c0_i32 = arith.constant 0 : i32
    %c0_i32_0 = arith.constant 0 : i32
    %c0_i32_1 = arith.constant 0 : i32
    return %arg1, %c0_i32, %c0_i32_0 : i32, i32, i32
  }
  func.func @transform_8(%arg0: i32, %arg1: i32) -> (i32, i32, i32) {
    %c0_i32 = arith.constant 0 : i32
    %c0_i32_0 = arith.constant 0 : i32
    %c0_i32_1 = arith.constant 0 : i32
    return %arg1, %c0_i32, %c0_i32_0 : i32, i32, i32
  }
  func.func @transform_9(%arg0: i32, %arg1: i32) -> (i32, i32, i32) {
    %c0_i32 = arith.constant 0 : i32
    %c0_i32_0 = arith.constant 0 : i32
    %c0_i32_1 = arith.constant 0 : i32
    return %arg1, %c0_i32, %c0_i32_0 : i32, i32, i32
  }
  func.func @transform_10(%arg0: i32, %arg1: i32) -> (i32, i32, i32) {
    %c0_i32 = arith.constant 0 : i32
    %c0_i32_0 = arith.constant 0 : i32
    %c0_i32_1 = arith.constant 0 : i32
    return %arg1, %c0_i32, %c0_i32_0 : i32, i32, i32
  }
  func.func @transform_11(%arg0: i32, %arg1: i32) -> (i32, i32) {
    %c0_i32 = arith.constant 0 : i32
    %c0_i32_0 = arith.constant 0 : i32
    %c0_i32_1 = arith.constant 0 : i32
    return %c0_i32, %c0_i32_0 : i32, i32
  }
  func.func @transform_12(%arg0: i32, %arg1: i32) -> (i32, i32) {
    %c0_i32 = arith.constant 0 : i32
    %c0_i32_0 = arith.constant 0 : i32
    %c0_i32_1 = arith.constant 0 : i32
    return %c0_i32, %c0_i32_0 : i32, i32
  }
  func.func @transform_13(%arg0: i32, %arg1: i32) -> (i32, i32) {
    %c0_i32 = arith.constant 0 : i32
    %c0_i32_0 = arith.constant 0 : i32
    %c0_i32_1 = arith.constant 0 : i32
    return %c0_i32, %c0_i32_0 : i32, i32
  }
  func.func @transform_14(%arg0: i32, %arg1: i32) -> (i32, i32, i32) {
    %c0_i32 = arith.constant 0 : i32
    %c0_i32_0 = arith.constant 0 : i32
    %c0_i32_1 = arith.constant 0 : i32
    return %arg0, %c0_i32, %c0_i32_0 : i32, i32, i32
  }
}

</mosaic_0001>

<bundles_post_ra>
// kernel: tpu_custom_call.1
= control target key start
LH: loop header
LB: loop body
LE: loop exit
PB: predicated region body
PF: predicated region fallthrough
CT: control target
= control target key end

     0   :  { %s1666_s0 = inlined_call_operand.vmem [shape: f32[2,8,32], index: 0, kind: input, shape index: {}]   ;;  %s1667_s1 = inlined_call_operand.vmem [shape: f32[2,8,32], index: 1, kind: input, shape index: {}]   ;;  %s1668_s2 = inlined_call_operand.vmem [shape: f32[2,16,32], index: 2, kind: input, shape index: {}]   ;;  %s1669_s3 = inlined_call_operand.vmem [shape: f32[2,16,32], index: 3, kind: input, shape index: {}]   ;;  %s1670_s4 = inlined_call_operand.vmem [shape: f32[4,32,8], index: 4, kind: input, shape index: {}]   ;;  %s1671_s5 = inlined_call_operand.vmem [shape: f32[4,1,8], index: 5, kind: input, shape index: {}]   ;;  %s1672_s6 = inlined_call_operand.vmem [shape: f32[4,32,8], index: 6, kind: input, shape index: {}]   ;;  %s1673_s7 = inlined_call_operand.vmem [shape: f32[4,1,8], index: 7, kind: input, shape index: {}]   ;;  %s1674_s8 = inlined_call_operand.vmem [shape: f32[4,32,8], index: 8, kind: input, shape index: {}]   ;;  %s1675_s9 = inlined_call_operand.vmem [shape: f32[4,1,8], index: 9, kind: input, shape index: {}]   ;;  %s1676_s10 = inlined_call_operand.vmem [shape: f32[4,8,32], index: 10, kind: input, shape index: {}]   ;;  %s1677_s11 = inlined_call_operand.vmem [shape: f32[1,32], index: 11, kind: input, shape index: {}]   ;;  %s1678_s12 = inlined_call_operand.vmem [shape: f32[1,32], index: 12, kind: input, shape index: {}]   ;;  %s1679_s13 = inlined_call_operand.vmem [shape: f32[1,32], index: 13, kind: input, shape index: {}]   ;;  %s1680_s14 = inlined_call_operand.hbm [shape: f32[2,8,32], index: 14, kind: output, shape index: {}]  }
   0x1   :  { %1695 = sst [smem:[#allocation18_spill]] %s1666_s0 }
   0x2   :  { %1696 = sst [smem:[#allocation19_spill]] %s1667_s1 }
   0x3   :  { %1697 = sst [smem:[#allocation20_spill]] %s1668_s2 }
   0x4   :  { %1698 = sst [smem:[#allocation21_spill]] %s1669_s3 }
   0x5   :  { %1699 = sst [smem:[#allocation22_spill]] %s1670_s4 }
   0x6   :  { %1700 = sst [smem:[#allocation23_spill]] %s1677_s11 }
   0x7   :  { %1701 = sst [smem:[#allocation24_spill]] %s1678_s12 }
   0x8   :  { %1702 = sst [smem:[#allocation25_spill]] %s1679_s13 }
   0x9   :  { %1703 = sst [smem:[#allocation26_spill]] %s1680_s14 }
   0xa   :  { %19 = vsyncpa [#allocation4], 0 }
   0xb   :  { %21 = vsyncpa [#allocation4 + $0x1], 0  ;;  %s1427_s29 = smov 0   ;;  %s1429_s30 = smov 0  }
   0xc   :  { %s1431_s15 = smov 0   ;;  %s1433_s16 = smov 0  }
   0xd   :  { %s1435_s17 = smov 0   ;;  %s1437_s18 = smov 0  }
   0xe   :  { %s1439_s19 = smov 0   ;;  %s1441_s20 = smov 0  }
   0xf LB: > { %1704 = sst [smem:[#allocation6_spill]] %s1320_s29  ;;  %s1127_s21 = sadd.s32 4294967295, %s1348_s20   ;;  %s1348_s20 = sphi %s1441_s20, %s27_s20   ;;  %s1344_s19 = sphi %s1439_s19, %s1741_s19   ;;  %s1340_s18 = sphi %s1437_s18, %s1740_s18   ;;  %s1336_s17 = sphi %s1435_s17, %s1739_s17   ;;  %s1332_s16 = sphi %s1433_s16, %s1738_s16   ;;  %s1328_s15 = sphi %s1431_s15, %s1737_s15   ;;  %s1324_s30 = sphi %s1429_s30, %s1736_s30   ;;  %s1320_s29 = sphi %s1427_s29, %s1735_s29  }
  0x10   : > { %1705 = sst [smem:[#allocation7_spill]] %s1324_s30  ;;  %s1128_s22 = sadd.s32 4294967294, %s1348_s20  }
  0x11   : > { %1706 = sst [smem:[#allocation8_spill]] %s1328_s15  ;;  %s36_s23 = sadd.s32 1, %s1340_s18 }
  0x12   : > { %1707 = sst [smem:[#allocation9_spill]] %s1336_s17  ;;  %p37_p0 = scmp.ge.s32.totalorder %s36_s23, 4 }
  0x13   : > { %1708 = sst [smem:[#allocation10_spill]] %s1340_s18  ;;  %s39_s24 = sadd.s32 1, %s1344_s19 }
  0x14   : > { %1709 = sst [smem:[#allocation11_spill]] %s1344_s19  ;;  %p405_p1 = scmp.ne.s32.totalorder %s1328_s15, %s1324_s30 }
  0x15   : > { %1710 = sst [smem:[#allocation12_spill]] %s1348_s20  ;;  %p406_p2 = scmp.eq.s32.totalorder %s1127_s21, 7 }
  0x16   : > { %s1743_s23 = smov (%p37_p0, %s36_s23), 0  ;;  %s1745_s24 = smov (!%p37_p0, %s39_s24), %s1344_s19 }
  0x17   : > { %1711 = sst [smem:[#allocation13_spill]] %s1743_s23  ;;  %p1476_p3 = por %p406_p2, %p405_p1 }
  0x18   : > { %p411_p4 = scmp.ne.s32.totalorder %s1324_s30, %s1320_s29  ;;  %p41_p5 = scmp.ge.s32.totalorder %s1745_s24, 2 }
  0x19   : > { %s1712_s25 = scalar_select %p1476_p3, 1, 0 }
  0x1a   : > { %p412_p6 = scmp.eq.s32.totalorder %s1128_s22, 7  ;;  %p1131_p7 = scmp.ge.s32.totalorder %s1348_s20, 1 }
  0x1b   : > { %1713 = sst [smem:[#allocation14_spill]] %s1712_s25  ;;  %p518_p8 = scmp.lt.s32.totalorder %s1348_s20, 9 }
  0x1c   : > { %s1747_s24 = smov (%p41_p5, %s1745_s24), 0  ;;  %p1486_p9 = por %p412_p6, %p411_p4 }
  0x1d   : > { %1714 = sst [smem:[#allocation15_spill]] %s1747_s24  ;;  %p519_p10 = pnand %p1131_p7, %p518_p8 }
  0x1e   : > { %s1715_s26 = scalar_select %p1486_p9, 1, 0 }
  0x1f   : > { %s392_s27 = ssub.s32 %s1344_s19, %s1747_s24  ;;  %s395_s28 = sadd.s32 1, %s1328_s15 }
  0x20   : > { %1716 = sst [smem:[#allocation16_spill]] %s1715_s26  ;;  %p393_p11 = scmp.eq.s32.totalorder %s392_s27, 0 }
  0x21   : > { %522 = sbr.rel (%p519_p10) target bundleno = 1168 (0x490), region = 76  ;;  %s1686_s22 = sand.u32 (!%p519_p10), 1, %s1324_s30  }
  0x22   : > { %s1494_s21 = scalar_select %p393_p11, %s1328_s15, %s395_s28  }
  0x23   : > { %p605_p12 = scmp.lt.s32.totalorder (!%p519_p10), %s1336_s17, 1  ;;  %s1500_s23 = sshll.u32 (!%p519_p10), %s1686_s22, 3 }
  0x24   : > { %1717 = sst [smem:[#allocation17_spill]] %s1494_s21  ;;  %p623_p13 = scmp.lt.s32.totalorder (!%p519_p10), %s1332_s16, 3 }
  0x25   : > { %s1718_s0 = sld [smem:[#allocation18_spill]] (!%p519_p10)  ;;  %s604_s22 = scalar_lea.vmem (!%p519_p10), [#allocation3], %s1500_s23 }
  0x26   : > { %s606_s18 = scalar_select %p605_p12, %s1336_s17, 1 }
  0x27   : > { %s1505_s26 = scalar_select %p623_p13, %s1332_s16, 3 }
  0x28   : > { %s1133_s27 = sshll.u32 %s606_s18, 3  ;;  %s1162_s28 = sshll.u32 %s606_s18, 4 }
  0x29   : > { %s1719_s1 = sld [smem:[#allocation19_spill]]  ;;  %s1164_s18 = sshll.u32 %s1505_s26, 5 }
  0x2a   : > { %s1720_s2 = sld [smem:[#allocation20_spill]]  ;;  %s635_s14 = scalar_lea.vmem %s1672_s6, %s1164_s18 }
  0x2b   : > { %s1510_s21 = scalar_lea.vmem %s1718_s0, %s1133_s27  ;;  %s1721_s3 = sld [smem:[#allocation21_spill]] }
  0x2c   : > { %s1722_s4 = sld [smem:[#allocation22_spill]]  ;;  %s638_s30 = scalar_lea.vmem %s1673_s7, %s1505_s26 }
  0x2d   : > { %s646_s24 = scalar_lea.vmem %s1675_s9, %s1505_s26  ;;  %s1145_s0 = sshll.u32 %s1505_s26, 3 }
  0x2e   : > { %p1146_p0 = scmp.ne.s32.totalorder %s1332_s16, 0 }
  0x2f   : > { %s1515_s29 = scalar_lea.vmem %s1719_s1, %s1133_s27 }
  0x30   : > { %s1520_s25 = scalar_lea.vmem %s1720_s2, %s1162_s28  ;;  %s1547_s2 = scalar_lea.vmem %s1674_s8, %s1164_s18 }
  0x31   : > { %s1525_s13 = scalar_lea.vmem %s1721_s3, %s1162_s28  ;;  %654 = sbr.rel (%p1146_p0) target bundleno = 56 (0x38), region = 80 }
  0x32   : > { %s1535_s15 = scalar_lea.vmem %s1722_s4, %s1164_s18  ;;  %s1557_s4 = scalar_lea.vmem %s1676_s10, %s1145_s0 }
  0x36   : > { %vm655_vm0 = vcmask 261120   ;;  %v1350_v0 = vmov 0.0  }
  0x37   : > { %656 = vst.msk [vmem:[#allocation2] sm:$0xff] %vm655_vm0, %v1350_v0 }
  0x38 PF: > { %v701_v1 = vld [vmem:[%s635_s14 + $0x18] sm:$0xff]  ;;  %v700_v2 = vld [vmem:[%s635_s14 + $0x10] sm:$0xff]  ;;  %v660_v3 = vld [vmem:[%s1520_s25] sm:$0xff]  ;;  %vm674_vm1 = vcmask 261120   ;;  %vm772_vm2 = vcmask 64512   ;;  %vm803_vm3 = vcmask 130048  }
  0x39   : > { %724 = vmatpush.msra.mxu1 %v701_v1  ;;  %v662_v4 = vld [vmem:[%s1525_s13] sm:$0xff]  ;;  %v699_v5 = vld [vmem:[%s635_s14 + $0x8] sm:$0xff]  ;;  %v669_v6 = vld [vmem:[%s1535_s15 + $0x18] sm:$0xff]  ;;  %p1157_p1 = scmp.ne.s32.totalorder %s1332_s16, 3 }
  0x3a   : > { %v698_v7 = vld [vmem:[%s635_s14] sm:$0xff]  ;;  %690 = vmatpush.msra.mxu0 %v669_v6  ;;  %v668_v8 = vld [vmem:[%s1535_s15 + $0x10] sm:$0xff]  ;;  %v667_v9 = vld [vmem:[%s1535_s15 + $0x8] sm:$0xff]  ;;  %v664_v10 = vadd.f32 %v662_v4, %v660_v3  ;;  %s1726_s20 = sld [smem:[#allocation25_spill]] (!%p1157_p1) }
  0x3b   : > { %725 = vmatpush.msra.mxu1 %v700_v2  ;;  %v657_v11 = vld [vmem:[%s1510_s21] sm:$0xff]  ;;  %v661_v15 = vld [vmem:[%s1520_s25 + $0x8] sm:$0xff]  ;;  %s1723_s25 = scalar_lea.vmem %s1671_s5, %s1505_s26  ;;  %v738_v26 = vld [vmem:[%s1547_s2 + $0x18] sm:$0xff]  ;;  %s1724_s26 = sld [smem:[#allocation23_spill]] (!%p1157_p1) }
  0x3c   : > { %v658_v12 = vld [vmem:[%s1515_s29] sm:$0xff]  ;;  %691 = vmatpush.msra.mxu0 %v668_v8  ;;  %v663_v16 = vld [vmem:[%s1525_s13 + $0x8] sm:$0xff]  ;;  %v737_v27 = vld [vmem:[%s1547_s2 + $0x10] sm:$0xff]  ;;  %761 = vmatpush.msra.mxu2 %v738_v26 }
  0x3d   : > { %726 = vmatpush.msra.mxu1 %v699_v5  ;;  %v666_v13 = vld [vmem:[%s1535_s15] sm:$0xff]  ;;  %v659_v14 = vadd.f32 %v658_v12, %v657_v11  ;;  %v665_v17 = vadd.f32 %v663_v16, %v661_v15  ;;  %v736_v28 = vld [vmem:[%s1547_s2 + $0x8] sm:$0xff] }
  0x3e   : > { %692 = vmatpush.msra.mxu0 %v667_v9  ;;  %v1240_v19 = vld [vmem:[%s638_s30] ss:$0 sm:$0xff]  ;;  %762 = vmatpush.msra.mxu2 %v737_v27 }
  0x3f   : > { %727 = vmatpush.msra.mxu1 %v698_v7  ;;  %v1241_v22 = vld [vmem:[%s1723_s25] ss:$0 sm:$0xff] }
  0x40   : > { %1148 = vmatmul.msk.f32.vlgmr.msra.gmra.mxu1 %vm674_vm1, %v664_v10  ;;  %693 = vmatpush.msra.mxu0 %v666_v13  ;;  %v735_v29 = vld [vmem:[%s1547_s2] sm:$0xff] }
  0x41   : > { %1147 = vmatmul.msk.f32.vlgmr.msra.gmra.mxu0 %vm674_vm1, %v659_v14  ;;  %763 = vmatpush.msra.mxu2 %v736_v28  ;;  %v1242_v34 = vld [vmem:[%s646_s24] ss:$0 sm:$0xff]  ;;  %s1725_s24 = sld [smem:[#allocation24_spill]] (!%p1157_p1) }
  0x42   : > { %v852_v43 = vld [vmem:[%s1557_s4] sm:$0xff] }
  0x43   : > { %764 = vmatpush.msra.mxu2 %v735_v29  ;;  %v851_v57 = vld [vmem:[#allocation2] sm:$0xff] }
  0x44   : > { %1150 = vmatmul.msk.f32.vlgmr.msra.gmra.mxu2 %vm674_vm1, %v660_v3 }
  0x48   : > { %1149 = vmatmul.msk.f32.gmra.mxu1 %vm674_vm1, %v665_v17 }
  0x4c   : > { %1151 = vmatmul.msk.f32.gmra.mxu2 %vm674_vm1, %v661_v15 }
  0xbd   : > { %v729_v18 = vpop.f32.mrf.mxu1 }
  0xbe   : > { %v695_v23 = vpop.f32.mrf.mxu0  ;;  %v730_v24 = vadd.f32 %v1240_v19, %v729_v18 }
  0xbf   : > { %v696_v25 = vadd.f32 %v1241_v22, %v695_v23 }
  0xc5   : > { %v732_v20 = vpop.f32.mrf.mxu1 }
  0xc6   : > { %v733_v21 = vadd.f32 %v1240_v19, %v732_v20 }
  0xc7   : > { %v766_v33 = vpop.f32.mrf.mxu2 }
  0xc8   : > { %1152 = vmatpush.xpose.msk.msra.mxu3 %vm772_vm2, %v733_v21  ;;  %v767_v38 = vadd.f32 %v1242_v34, %v766_v33 }
  0xcc   : > { %1153 = vmatpush.xpose.msk.msra.mxu3 %vm772_vm2, %v730_v24 }
  0xcf   : > { %1154 = vmatmul.msk.f32.vlgmr.msra.gmra.mxu3 %vm772_vm2, %v696_v25  ;;  %v769_v36 = vpop.f32.mrf.mxu2 }
  0xd0   : > { %v770_v39 = vadd.f32 %v1242_v34, %v769_v36  ;;  %871 = vmatpush.msrb.mxu3 %v852_v43 }
  0xd2   : > { %845 = vmatpush.msrb.mxu0 %v770_v39 }
  0xd4   : > { %846 = vmatpush.msrb.mxu0 %v767_v38 }
 0x152   : > { %v799_v30 = vpop.f32.mrf.mxu3 }
 0x153   : > { %v802_v31 = vmul.f32 0.35355338, %v799_v30 }
 0x155   : > { %v804_v32 = vsel %vm803_vm3, %v802_v31, -inf }
 0x156   : > { %805 = vmax.xlane.f32.xlu0 %v804_v32 }
 0x1c9   : > { %v806_v35 = vpop.xlane.xlu0 %805 }
 0x1ca   : > { %v807_v37 = vsub.f32 %v802_v31, %v806_v35 }
 0x1cc   : > { %v808_v40 = vmul.f32 1.442695, %v807_v37 }
 0x1ce   : > { %1243 = vpow2.f32 %v808_v40 }
 0x1d4   : > { %v1244_v41 = vpop.eup %1243 }
 0x1d5   : > { %v810_v42 = vsel %vm803_vm3, %v1244_v41, 0.0 }
 0x1d6   : > { %811 = vadd.xlane.f32.xlu0 %v810_v42 }
 0x249   : > { %v812_v44 = vpop.xlane.xlu0 %811 }
 0x24a   : > { %1245 = vrcp.f32 %v812_v44  ;;  %v824_v48 = vand.u32 2147483648, %v812_v44  ;;  %v822_v50 = vand.u32 2147483647, %v812_v44  ;;  %vm818_vm5 = vweird.f32 %v812_v44 }
 0x24c   : > { %v825_v52 = vor.u32 1.1754944e-38, %v824_v48  ;;  %vm823_vm7 = vcmp.eq.f32.partialorder %v822_v50, 8.507059e+37 }
 0x250   : > { %v1246_v45 = vpop.eup %1245 }
 0x251   : > { %v814_v46 = vmul.f32 %v1246_v45, %v812_v44  ;;  %vm819_vm4 = vweird.f32 %v1246_v45 }
 0x252   : > { %vm820_vm6 = vmor %vm818_vm5, %vm819_vm4 }
 0x253   : > { %v815_v47 = vsub.f32 1.0, %v814_v46 }
 0x255   : > { %v816_v49 = vmul.f32 %v1246_v45, %v815_v47 }
 0x257   : > { %v817_v51 = vadd.f32 %v1246_v45, %v816_v49 }
 0x259   : > { %v821_v53 = vsel %vm820_vm6, %v1246_v45, %v817_v51 }
 0x25a   : > { %v826_v54 = vsel %vm823_vm7, %v825_v52, %v821_v53 }
 0x25b   : > { %v827_v55 = vmul.f32 %v1244_v41, %v826_v54 }
 0x25d   : > { %1155 = vmatmul.msk.f32.vlgmr.msrb.gmra.mxu0 %vm803_vm3, %v827_v55 }
 0x2da   : > { %v848_v56 = vpop.f32.mrf.mxu0 }
 0x2db   : > { %1156 = vmatmul.msk.f32.vlgmr.msrb.gmra.mxu3 %vm772_vm2, %v848_v56 }
 0x35d   : > { %881 = sbr.rel (%p1157_p1) target bundleno = 1146 (0x47a), region = 84 }
 0x35e   : > { %v873_v58 = vpop.f32.mrf.mxu3 }
 0x35f   : > { %v876_v59 = vadd.f32 %v873_v58, %v851_v57 }
 0x361   : > { %877 = vst.msk [vmem:[#allocation2] sm:$0xff] %vm674_vm1, %v876_v59 }
 0x362   : > { %v1247_v61 = vld [vmem:[%s1724_s26] ss:$0 sm:$0xff]  ;;  %v1351_v2 = vmov 32.0  }
 0x363   : > { %v888_v62 = vld [vmem:[%s1510_s21] sm:$0xff]  ;;  %1250 = vrcp.f32 %v1351_v2 }
 0x364   : > { %v1248_v23 = vld [vmem:[%s1725_s24] ss:$0 sm:$0xff] }
 0x365   : > { %v1249_v25 = vld [vmem:[%s1726_s20] ss:$0 sm:$0xff] }
 0x368   : > { %v882_v60 = vld [vmem:[#allocation2] sm:$0xff] }
 0x369   : > { %v887_v63 = vadd.f32 %v1247_v61, %v882_v60  ;;  %v1251_v3 = vpop.eup %1250 }
 0x36a   : > { %v894_v4 = vmul.f32 32.0, %v1251_v3  ;;  %vm898_vm8 = vweird.f32 %v1251_v3 }
 0x36b   : > { %v889_v0 = vadd.f32 %v888_v62, %v887_v63 }
 0x36c   : > { %v895_v5 = vsub.f32 1.0, %v894_v4 }
 0x36d   : > { %v890_v1 = vsel %vm674_vm1, %v889_v0, 0.0 }
 0x36e   : > { %891 = vadd.xlane.f32.xlu0 %v890_v1  ;;  %v896_v6 = vmul.f32 %v1251_v3, %v895_v5 }
 0x370   : > { %v897_v7 = vadd.f32 %v1251_v3, %v896_v6 }
 0x372   : > { %v899_v8 = vsel %vm898_vm8, %v1251_v3, %v897_v7 }
 0x3e1   : > { %v892_v9 = vpop.xlane.xlu0 %891 }
 0x3e2   : > { %v900_v10 = vmul.f32 %v899_v8, %v892_v9 }
 0x3e4   : > { %v901_v11 = vsub.f32 %v889_v0, %v900_v10 }
 0x3e6   : > { %v902_v12 = vmul.f32 %v901_v11, %v901_v11 }
 0x3e8   : > { %v903_v13 = vsel %vm674_vm1, %v902_v12, 0.0 }
 0x3e9   : > { %904 = vadd.xlane.f32.xlu0 %v903_v13 }
 0x45c   : > { %v905_v14 = vpop.xlane.xlu0 %904 }
 0x45d   : > { %v906_v15 = vmul.f32 %v905_v14, %v899_v8 }
 0x45f   : > { %v907_v16 = vadd.f32 1e-05, %v906_v15 }
 0x461   : > { %1252 = vrsqrt.f32 %v907_v16  ;;  %vm914_vm10 = vweird.f32 %v907_v16 }
 0x467   : > { %v1253_v17 = vpop.eup %1252 }
 0x468   : > { %v909_v18 = vmul.f32 %v1253_v17, %v907_v16  ;;  %vm915_vm9 = vweird.f32 %v1253_v17 }
 0x469   : > { %vm916_vm11 = vmor %vm914_vm10, %vm915_vm9 }
 0x46a   : > { %v910_v19 = vmul.f32 %v1253_v17, %v909_v18 }
 0x46c   : > { %v911_v20 = vmul.f32 0.5, %v910_v19 }
 0x46e   : > { %v912_v21 = vsub.f32 1.5, %v911_v20 }
 0x470   : > { %v913_v22 = vmul.f32 %v1253_v17, %v912_v21 }
 0x472   : > { %v917_v24 = vsel %vm916_vm11, %v1253_v17, %v913_v22 }
 0x473   : > { %v918_v26 = vmul.f32 %v917_v24, %v901_v11 }
 0x475   : > { %v923_v27 = vmul.f32 %v1248_v23, %v918_v26 }
 0x477   : > { %v928_v28 = vadd.f32 %v1249_v25, %v923_v27 }
 0x479   : > { %929 = vst.msk [vmem:[%s604_s22] sm:$0xff] %vm674_vm1, %v928_v28 }
 0x47a PF: > { %s1727_s30 = sld [smem:[#allocation9_spill]]  ;;  %s943_s3 = sshll.u32 %s604_s22, 4  ;;  %s944_s3 = int_to_ptr.vmem [resolvable:$true] %s943_s3 }
 0x47b   : > { %s1728_s17 = sld [smem:[#allocation7_spill]] }
 0x47c   : > { %s1730_s11 = sld [smem:[#allocation26_spill]] }
 0x480   : > { %s1159_s12 = sshll.u32 %s1727_s30, 3 }
 0x481   : > { %s1731_s29 = sand.u32 1, %s1728_s17  }
 0x482   : > { %s941_s1 = scalar_lea.hbm %s1730_s11, %s1159_s12  ;;  %s931_s25 = scalar_lea.sflag [#allocation4], %s1731_s29 }
 0x483   : > { %s945_s13 = sshll.u32 %s941_s1, 4  ;;  %s1274_s26 = scalar_lea.hbm %s1730_s11, 16  ;;  %s946_s13 = int_to_ptr.hbm [resolvable:$true] %s945_s13 }
 0x484   : > { %s1268_s18 = sshra.s32 %s946_s13, 4  ;;  %s1269_s18 = int_to_ptr.hbm [resolvable:$true] %s1268_s18 }
 0x485   : > { %s1270_s15 = scalar_lea.hbm %s1269_s18, 8  ;;  %p1275_p6 = scmp.lt.s32.totalorder %s1269_s18, %s1730_s11 }
 0x486   : > { %p1271_p2 = scmp.ne.s32.totalorder %s1269_s18, %s1270_s15  ;;  %p1276_p7 = scmp.lt.s32.totalorder %s1274_s26, %s1270_s15 }
 0x488   : > { %p1272_p4 = pnand %p1271_p2, %p1476_p3  ;;  %p1277_p8 = por %p1276_p7, %p1275_p6 }
 0x48a   : > { %p1273_p5 = pneg %p1272_p4 }
 0x48c   : > { %p1278_p10 = pnand %p1277_p8, %p1273_p5 }
 0x48e   : > { %1281 = shalt.err (!%p1278_p10)
}
 0x48f   : > { %1167 = dma.vmem_to_hbm [thread:$0]  (%p1476_p3), %s944_s3, 128, %s946_s13, %s931_s25  }
 0x490 PF: > { %s1732_s23 = sld [smem:[#allocation12_spill]] }
 0x491   : > { %s1733_s22 = sld [smem:[#allocation6_spill]] }
 0x496   : > { %p1173_p11 = scmp.ge.s32.totalorder %s1732_s23, 2 }
 0x497   : > { %s957_s27 = sand.u32 1, %s1733_s22  }
 0x498   : > { %p1170_p12 = pnand %p1173_p11, %p1486_p9  ;;  %s958_s14 = scalar_lea.sflag [#allocation4], %s957_s27 }
 0x49a   : > { %p1171_p13 = pneg %p1170_p12 }
 0x49c   : > { %1315 = dma.done.wait (%p1171_p13), %s958_s14, 128  }
 0x49d   : > { %1317 = vsyncadd (%p1171_p13), %s958_s14, 4294967168  ;;  %s27_s20 = sadd.s32 1, %s1732_s23   ;;  %s1735_s29 = sld [smem:[#allocation7_spill]] }
 0x49e   : > { %p24_p0 = scmp.ge.s32.totalorder %s27_s20, 10   ;;  %s1736_s30 = sld [smem:[#allocation8_spill]] }
 0x49f   : > { %s1737_s15 = sld [smem:[#allocation17_spill]] }
 0x4a0   : > { %s1738_s16 = sld [smem:[#allocation10_spill]]  ;;  %26 = sbr.rel (!%p24_p0) target bundleno = 15 (0xf), region = 149 }
 0x4a1   : > { %s1739_s17 = sld [smem:[#allocation11_spill]] }
 0x4a2   : > { %s1740_s18 = sld [smem:[#allocation13_spill]] }
 0x4a3   : > { %s1741_s19 = sld [smem:[#allocation15_spill]] }
 0x4a5   :  { %964 = vsyncpa [#allocation4], 1 }
 0x4a6   :  { %966 = vsyncpa [#allocation4 + $0x1], 1 }

</bundles_post_ra>
